<compile_context>
chip_gen: v5e
topology: v5e:2x2
jax: 0.10.0
libtpu: 0.0.40
codegen_flags: <defaults>
</compile_context>

<pallas_src>
import jax
import jax.numpy as jnp
from jax.experimental import pallas as pl
from jax.experimental.pallas import tpu as pltpu


def _round_up(n: int, m: int) -> int:
    return ((n + m - 1) // m) * m


def _tile_vmem_bytes(shape2d, dtype) -> int:
    """VMEM footprint of a 2-D tile after (sublane, 128)-lane padding."""
    r, c = shape2d
    itemsize = jnp.dtype(dtype).itemsize
    sublane = 8 * max(1, 4 // itemsize)         # f32: 8, bf16: 16, int8: 32
    return _round_up(max(r, 1), sublane) * _round_up(max(c, 1), 128) * itemsize


def mlp_kernel(x_ref, w1_ref, b1_ref, w2_ref, b2_ref, o_ref):
    # Hidden layer: Linear on the MXU (f32 accumulation) + bias + ReLU (f32 VPU).
    h = jnp.dot(x_ref[...], w1_ref[...], preferred_element_type=jnp.float32)
    h = jnp.maximum(h + b1_ref[...].astype(jnp.float32), 0.0)          # (tm, H)
    # Output layer (H -> 1): VPU multiply + XLU row-reduce instead of a
    # near-empty 1-column MXU pass; bias is an SMEM scalar.
    o = jnp.sum(h * w2_ref[...].astype(jnp.float32), axis=-1)          # (tm,)
    o = o + b2_ref[0, 0]
    # Lane-dense store: batch rows live along the 128-lane axis, unmasked vst.
    o_ref[...] = o[None, :].astype(o_ref.dtype)                        # (1, tm)


def mlp_forward(x, w1, b1, w2, b2, *, block_b=4096):
    """Fused MLP forward pass.

    x : (B, D)   input
    w1: (D, H)   hidden weight, pre-transposed (== torch Linear.weight.T)
    b1: (1, H)   hidden bias
    w2: (1, H)   output weight (same layout as torch nn.Linear(H, 1).weight)
    b2: (1, 1)   output bias (held as an f32 SMEM scalar)
    returns (B, 1) in x.dtype  ==  Linear(ReLU(Linear(x)))
    """
    B, D = x.shape
    H = w1.shape[1]

    # Tiny batches: pad once to one minimal 128-row tile (negligible traffic).
    # Large batches are NOT padded; the ragged last block is masked by Pallas.
    if B < 128:
        x = jnp.pad(x, ((0, 128 - B), (0, 0)))
        B_rows = 128
    else:
        B_rows = B

    # Batch tile: multiple of 128 (lane-dense output), as large as block_b,
    # but capped so the grid has >= 2 steps when possible (keeps both v7x
    # TensorCores busy; harmless on the 1-TC v5e/v6e).
    block_b = max(128, _round_up(block_b, 128))
    tm = min(block_b, _round_up(B_rows, 128))
    if _round_up(B_rows, 128) > 128 and pl.cdiv(B_rows, tm) < 2:
        tm = max(128, _round_up(pl.cdiv(B_rows, 2), 128))
    grid_b = pl.cdiv(B_rows, tm)
    out_cols = grid_b * tm                       # fully tiled output slab

    # VMEM budget from lane-padded tile sizes, with headroom, <= 48 MiB (v7x).
    est = (2 * _tile_vmem_bytes((tm, D), x.dtype)          # double-buffered x
           + _tile_vmem_bytes((D, H), w1.dtype)            # resident w1
           + 2 * _tile_vmem_bytes((1, H), w1.dtype)        # resident b1, w2
           + 2 * _tile_vmem_bytes((1, tm), x.dtype)        # double-buffered out
           + 3 * _tile_vmem_bytes((tm, H), jnp.float32))   # f32 hidden temps
    vmem_limit = int(min(48 << 20, max(16 << 20, est * 3 // 2 + (4 << 20))))

    out = pl.pallas_call(
        mlp_kernel,
        out_shape=jax.ShapeDtypeStruct((1, out_cols), x.dtype),
        grid=(grid_b,),
        in_specs=[
            pl.BlockSpec((tm, D), lambda i: (i, 0)),            # x streams
            pl.BlockSpec((D, H), lambda i: (0, 0)),             # w1 resident
            pl.BlockSpec((1, H), lambda i: (0, 0)),             # b1 resident
            pl.BlockSpec((1, H), lambda i: (0, 0)),             # w2 resident
            pl.BlockSpec(memory_space=pltpu.MemorySpace.SMEM),  # b2 scalar
        ],
        out_specs=pl.BlockSpec((1, tm), lambda i: (0, i)),      # lane-dense out
        compiler_params=pltpu.CompilerParams(
            dimension_semantics=("parallel",),
            vmem_limit_bytes=vmem_limit,
        ),
    )(x, w1, b1, w2, b2.astype(jnp.float32))

    # Rows >= B (ragged tail / tiny-batch pad) are garbage -> slice them off.
    return out[0, :B].reshape(B, 1)


def init_params(key, input_dim, hidden_dim, dtype=jnp.float32):
    """nn.Linear-style init: U(-1/sqrt(fan_in), 1/sqrt(fan_in)) for W and b."""
    k1, k2, k3, k4 = jax.random.split(key, 4)
    bound1 = 1.0 / (input_dim ** 0.5)
    bound2 = 1.0 / (hidden_dim ** 0.5)
    w1 = jax.random.uniform(k1, (input_dim, hidden_dim), dtype, -bound1, bound1)
    b1 = jax.random.uniform(k2, (1, hidden_dim), dtype, -bound1, bound1)
    w2 = jax.random.uniform(k3, (1, hidden_dim), dtype, -bound2, bound2)
    b2 = jax.random.uniform(k4, (1, 1), jnp.float32, -bound2, bound2)
    return w1, b1, w2, b2


def mlp_reference(x, w1, b1, w2, b2):
    """Pure-JAX reference (f32 epilogue, elementwise second layer)."""
    xf, w1f, b1f, w2f = (a.astype(jnp.float32) for a in (x, w1, b1, w2))
    h = jnp.maximum(jnp.dot(xf, w1f) + b1f, 0.0)
    o = jnp.sum(h * w2f, axis=-1, keepdims=True) + b2.astype(jnp.float32)
    return o.astype(x.dtype)


if __name__ == "__main__":
    # MLP(input_dim=32, hidden_dim=64, n_layers=1, dropout=0.0,
    #     activation='relu', use_batchnorm=False): Linear(32,64)->ReLU->Linear(64,1)
    batch, input_dim, hidden_dim = 8, 32, 64

    key = jax.random.PRNGKey(0)
    kx, kp = jax.random.split(key)
    x = jax.random.normal(kx, (batch, input_dim), jnp.float32)
    w1, b1, w2, b2 = init_params(kp, input_dim, hidden_dim)

    # f32 path, tiny batch (single padded 128-row tile).
    out = jax.block_until_ready(mlp_forward(x, w1, b1, w2, b2))
    ref = mlp_reference(x, w1, b1, w2, b2)
    assert out.shape == (batch, 1)
    assert jnp.allclose(out, ref, atol=1e-5, rtol=1e-5)

    # Larger batch exercises the unpadded ragged-grid path + >=2 grid steps.
    xb = jax.random.normal(jax.random.PRNGKey(1), (384, input_dim), jnp.float32)
    outb = jax.block_until_ready(mlp_forward(xb, w1, b1, w2, b2))
    refb = mlp_reference(xb, w1, b1, w2, b2)
    assert outb.shape == (384, 1)
    assert jnp.allclose(outb, refb, atol=1e-5, rtol=1e-5)

    # bf16 streaming path (halves x HBM bytes; MXU bf16-native, f32 epilogue).
    xh, w1h, b1h, w2h = (a.astype(jnp.bfloat16) for a in (x, w1, b1, w2))
    outh = jax.block_until_ready(mlp_forward(xh, w1h, b1h, w2h, b2))
    refh = mlp_reference(xh, w1h, b1h, w2h, b2)
    assert outh.shape == (batch, 1)
    assert jnp.allclose(outh.astype(jnp.float32), refh.astype(jnp.float32),
                        atol=5e-2, rtol=5e-2)

    print("KERNEL_OK")
</pallas_src>

<mosaic_0001>
module attributes {stable_mosaic.version = 11 : i64} {
  func.func @mlp_kernel(%arg0: i32, %arg1: memref<128x32xf32, #tpu.memory_space<vmem>>, %arg2: memref<32x64xf32, #tpu.memory_space<vmem>>, %arg3: memref<1x64xf32, #tpu.memory_space<vmem>>, %arg4: memref<1x64xf32, #tpu.memory_space<vmem>>, %arg5: memref<1x1xf32, #tpu.memory_space<smem>>, %arg6: memref<1x128xf32, #tpu.memory_space<vmem>>) attributes {dimension_semantics = [#tpu.dimension_semantics<parallel>], iteration_bounds = array<i64: 1>, scalar_prefetch = 0 : i64, scratch_operands = 0 : i64, tpu.core_type = #tpu.core_type<tc>, window_params = [{transform_indices = @transform_0, window_bounds = array<i64: 128, 32>}, {pipeline_mode = #tpu.pipeline_mode<synchronous>, transform_indices = @transform_1, window_bounds = array<i64: 32, 64>}, {pipeline_mode = #tpu.pipeline_mode<synchronous>, transform_indices = @transform_2, window_bounds = array<i64: 1, 64>}, {pipeline_mode = #tpu.pipeline_mode<synchronous>, transform_indices = @transform_3, window_bounds = array<i64: 1, 64>}, {transform_indices = @transform_4, window_bounds = array<i64: 1, 1>}, {transform_indices = @transform_5, window_bounds = array<i64: 1, 128>}]} {
    %c0 = arith.constant 0 : index
    %c0_0 = arith.constant 0 : index
    %0 = vector.load %arg1[%c0, %c0_0] : memref<128x32xf32, #tpu.memory_space<vmem>>, vector<128x32xf32>
    %c0_1 = arith.constant 0 : index
    %c0_2 = arith.constant 0 : index
    %1 = vector.load %arg2[%c0_1, %c0_2] : memref<32x64xf32, #tpu.memory_space<vmem>>, vector<32x64xf32>
    %cst = arith.constant dense<0.000000e+00> : vector<128x64xf32>
    %2 = tpu.matmul %0, %1, %cst {dimension_numbers = #tpu.dot_dimension_numbers<[1], [0], [0], [1], [0, 0, 1, 1], [], []>} : vector<128x32xf32>, vector<32x64xf32>, vector<128x64xf32> -> vector<128x64xf32>
    %c0_3 = arith.constant 0 : index
    %c0_4 = arith.constant 0 : index
    %3 = vector.load %arg3[%c0_3, %c0_4] : memref<1x64xf32, #tpu.memory_space<vmem>>, vector<1x64xf32>
    %4 = vector.broadcast %3 : vector<1x64xf32> to vector<128x64xf32>
    %5 = arith.addf %2, %4 : vector<128x64xf32>
    %cst_5 = arith.constant 0.000000e+00 : f32
    %6 = vector.broadcast %cst_5 : f32 to vector<128x64xf32>
    %7 = arith.maximumf %5, %6 : vector<128x64xf32>
    %c0_6 = arith.constant 0 : index
    %c0_7 = arith.constant 0 : index
    %8 = vector.load %arg4[%c0_6, %c0_7] : memref<1x64xf32, #tpu.memory_space<vmem>>, vector<1x64xf32>
    %9 = vector.broadcast %8 : vector<1x64xf32> to vector<128x64xf32>
    %10 = arith.mulf %7, %9 : vector<128x64xf32>
    %cst_8 = arith.constant dense<0.000000e+00> : vector<128xf32>
    %11 = vector.multi_reduction <add>, %10, %cst_8 [1] : vector<128x64xf32> to vector<128xf32>
    %c0_9 = arith.constant 0 : index
    %c0_10 = arith.constant 0 : index
    %12 = memref.load %arg5[%c0_9, %c0_10] : memref<1x1xf32, #tpu.memory_space<smem>>
    %13 = vector.broadcast %12 : f32 to vector<128xf32>
    %14 = arith.addf %11, %13 : vector<128xf32>
    %15 = vector.shape_cast %14 : vector<128xf32> to vector<1x128xf32>
    %c0_11 = arith.constant 0 : index
    %c0_12 = arith.constant 0 : index
    %16 = vector.load %arg6[%c0_11, %c0_12] : memref<1x128xf32, #tpu.memory_space<vmem>>, vector<1x128xf32>
    tpu.vector_store %arg6[%c0_11, %c0_12], %15 {strides = array<i32>} : memref<1x128xf32, #tpu.memory_space<vmem>>, vector<1x128xf32>,
    return
  }
  func.func @transform_0(%arg0: i32) -> (i32, i32) {
    %c0_i32 = arith.constant 0 : i32
    %c0_i32_0 = arith.constant 0 : i32
    return %arg0, %c0_i32 : i32, i32
  }
  func.func @transform_1(%arg0: i32) -> (i32, i32) {
    %c0_i32 = arith.constant 0 : i32
    %c0_i32_0 = arith.constant 0 : i32
    %c0_i32_1 = arith.constant 0 : i32
    return %c0_i32, %c0_i32_0 : i32, i32
  }
  func.func @transform_2(%arg0: i32) -> (i32, i32) {
    %c0_i32 = arith.constant 0 : i32
    %c0_i32_0 = arith.constant 0 : i32
    %c0_i32_1 = arith.constant 0 : i32
    return %c0_i32, %c0_i32_0 : i32, i32
  }
  func.func @transform_3(%arg0: i32) -> (i32, i32) {
    %c0_i32 = arith.constant 0 : i32
    %c0_i32_0 = arith.constant 0 : i32
    %c0_i32_1 = arith.constant 0 : i32
    return %c0_i32, %c0_i32_0 : i32, i32
  }
  func.func @transform_4(%arg0: i32) -> (i32, i32) {
    %c0_i32 = arith.constant 0 : i32
    %c0_i32_0 = arith.constant 0 : i32
    %c0_i32_1 = arith.constant 0 : i32
    return %c0_i32, %c0_i32_0 : i32, i32
  }
  func.func @transform_5(%arg0: i32) -> (i32, i32) {
    %c0_i32 = arith.constant 0 : i32
    %c0_i32_0 = arith.constant 0 : i32
    return %c0_i32, %arg0 : i32, i32
  }
}

</mosaic_0001>

<bundles_post_ra>
// kernel: tpu_custom_call.1
= control target key start
LH: loop header
LB: loop body
LE: loop exit
PB: predicated region body
PF: predicated region fallthrough
CT: control target
= control target key end

     0   :  { %vm46_vm0 = vcmask 261120   ;;  %s624_s0 = inlined_call_operand.vmem [shape: f32[128,32], index: 0, kind: input, shape index: {}]   ;;  %s625_s1 = inlined_call_operand.vmem [shape: f32[32,64], index: 1, kind: input, shape index: {}]   ;;  %s626_s2 = inlined_call_operand.vmem [shape: f32[1,64], index: 2, kind: input, shape index: {}]   ;;  %s627_s3 = inlined_call_operand.vmem [shape: f32[1,64], index: 3, kind: input, shape index: {}]   ;;  %s628_s4 = inlined_call_operand.<no memory space> [shape: f32[1,1], index: 4, kind: input, shape index: {}]   ;;  %s629_s5 = inlined_call_operand.hbm [shape: f32[1,128], index: 5, kind: output, shape index: {}]  }
   0x1   :  { %v41_v0 = vld [vmem:[%s625_s1 + $0x18] sm:$0xff]  ;;  %v40_v1 = vld [vmem:[%s625_s1 + $0x10] sm:$0xff]  ;;  %v39_v2 = vld [vmem:[%s625_s1 + $0x8] sm:$0xff] }
   0x2   :  { %107 = vmatpush.msra.mxu0 %v41_v0  ;;  %376 = vmatpush.msra.mxu1 %v41_v0  ;;  %v38_v3 = vld [vmem:[%s625_s1] sm:$0xff] }
   0x3   :  { %377 = vmatpush.msra.mxu2 %v41_v0  ;;  %378 = vmatpush.msra.mxu3 %v41_v0  ;;  %v22_v4 = vld [vmem:[%s624_s0] sm:$0xff] }
   0x4   :  { %108 = vmatpush.msra.mxu0 %v40_v1  ;;  %379 = vmatpush.msra.mxu1 %v40_v1  ;;  %v26_v5 = vld [vmem:[%s624_s0 + $0x20] sm:$0xff] }
   0x5   :  { %380 = vmatpush.msra.mxu2 %v40_v1  ;;  %381 = vmatpush.msra.mxu3 %v40_v1  ;;  %v30_v6 = vld [vmem:[%s624_s0 + $0x40] sm:$0xff] }
   0x6   :  { %109 = vmatpush.msra.mxu0 %v39_v2  ;;  %382 = vmatpush.msra.mxu1 %v39_v2  ;;  %v34_v7 = vld [vmem:[%s624_s0 + $0x60] sm:$0xff] }
   0x7   :  { %383 = vmatpush.msra.mxu2 %v39_v2  ;;  %384 = vmatpush.msra.mxu3 %v39_v2 }
   0x8   :  { %110 = vmatpush.msra.mxu0 %v38_v3  ;;  %385 = vmatpush.msra.mxu1 %v38_v3 }
   0x9   :  { %11 = vsyncpa [#allocation4], 0  ;;  %360 = vmatmul.msk.f32.vlgmr.msra.gmra.mxu0 %vm46_vm0, %v22_v4  ;;  %364 = vmatmul.msk.f32.vlgmr.msra.gmra.mxu1 %vm46_vm0, %v26_v5  ;;  %v23_v8 = vld [vmem:[%s624_s0 + $0x8] sm:$0xff]  ;;  %v24_v12 = vld [vmem:[%s624_s0 + $0x10] sm:$0xff]  ;;  %vm196_vm1 = vcmask 523264   ;;  %vm284_vm2 = vcmask 130112  }
   0xa   :  { %386 = vmatpush.msra.mxu2 %v38_v3  ;;  %387 = vmatpush.msra.mxu3 %v38_v3  ;;  %v27_v9 = vld [vmem:[%s624_s0 + $0x28] sm:$0xff]  ;;  %v28_v13 = vld [vmem:[%s624_s0 + $0x30] sm:$0xff]  ;;  %v25_v16 = vld [vmem:[%s624_s0 + $0x18] sm:$0xff]  ;;  %vm288_vm3 = vcmask 195712   ;;  %vm292_vm4 = vcmask 261312   ;;  %vm296_vm5 = vcmask 326912  }
   0xb   :  { %368 = vmatmul.msk.f32.vlgmr.msra.gmra.mxu2 %vm46_vm0, %v30_v6  ;;  %372 = vmatmul.msk.f32.vlgmr.msra.gmra.mxu3 %vm46_vm0, %v34_v7  ;;  %v31_v10 = vld [vmem:[%s624_s0 + $0x48] sm:$0xff]  ;;  %v32_v14 = vld [vmem:[%s624_s0 + $0x50] sm:$0xff]  ;;  %v29_v17 = vld [vmem:[%s624_s0 + $0x38] sm:$0xff]  ;;  %vm300_vm6 = vcmask 392512   ;;  %vm304_vm7 = vcmask 458112   ;;  %vm308_vm8 = vcmask 523712  }
   0xc   :  { %v35_v11 = vld [vmem:[%s624_s0 + $0x68] sm:$0xff]  ;;  %v36_v15 = vld [vmem:[%s624_s0 + $0x70] sm:$0xff]  ;;  %v33_v18 = vld [vmem:[%s624_s0 + $0x58] sm:$0xff]  ;;  %vm312_vm9 = vcmask 589312   ;;  %vm316_vm10 = vcmask 654912   ;;  %vm320_vm11 = vcmask 720512  }
   0xd   :  { %v37_v19 = vld [vmem:[%s624_s0 + $0x78] sm:$0xff]  ;;  %v527_v20 = vld [vmem:[%s626_s2] ss:$0 sm:$0xff]  ;;  %vm324_vm12 = vcmask 786112   ;;  %vm328_vm13 = vcmask 851712   ;;  %vm332_vm14 = vcmask 917312  }
   0xe   :  { %v534_v25 = vld [vmem:[%s627_s3] ss:$0 sm:$0xff]  ;;  %vm336_vm15 = vcmask 982912   ;;  %s351_s12 = sshll.u32 %s629_s5, 4  ;;  %s352_s12 = int_to_ptr.hbm [resolvable:$true] %s351_s12 }
  0x11   :  { %361 = vmatmul.msk.f32.gmra.mxu0 %vm46_vm0, %v23_v8  ;;  %365 = vmatmul.msk.f32.gmra.mxu1 %vm46_vm0, %v27_v9 }
  0x13   :  { %369 = vmatmul.msk.f32.gmra.mxu2 %vm46_vm0, %v31_v10  ;;  %373 = vmatmul.msk.f32.gmra.mxu3 %vm46_vm0, %v35_v11 }
  0x19   :  { %362 = vmatmul.msk.f32.gmra.mxu0 %vm46_vm0, %v24_v12  ;;  %366 = vmatmul.msk.f32.gmra.mxu1 %vm46_vm0, %v28_v13 }
  0x1b   :  { %370 = vmatmul.msk.f32.gmra.mxu2 %vm46_vm0, %v32_v14  ;;  %374 = vmatmul.msk.f32.gmra.mxu3 %vm46_vm0, %v36_v15 }
  0x21   :  { %363 = vmatmul.msk.f32.gmra.mxu0 %vm46_vm0, %v25_v16  ;;  %367 = vmatmul.msk.f32.gmra.mxu1 %vm46_vm0, %v29_v17 }
  0x23   :  { %371 = vmatmul.msk.f32.gmra.mxu2 %vm46_vm0, %v33_v18  ;;  %375 = vmatmul.msk.f32.gmra.mxu3 %vm46_vm0, %v37_v19  ;;  %vm340_vm0 = vcmask 1048512  }
  0x86   :  { %v112_v21 = vpop.f32.mrf.mxu0  ;;  %v124_v22 = vpop.f32.mrf.mxu1 }
  0x87   :  { %v113_v23 = vadd.f32 %v527_v20, %v112_v21  ;;  %v125_v24 = vadd.f32 %v527_v20, %v124_v22 }
  0x89   :  { %v160_v26 = vmax.f32 %v113_v23, 0.0  ;;  %v164_v27 = vmax.f32 %v125_v24, 0.0 }
  0x8b   :  { %v184_v28 = vmul.f32 %v534_v25, %v164_v27  ;;  %v180_v29 = vmul.f32 %v534_v25, %v160_v26 }
  0x8d   :  { %v209_v30 = vsel %vm196_vm1, %v184_v28, 0.0  ;;  %v197_v31 = vsel %vm196_vm1, %v180_v29, 0.0 }
  0x8e   :  { %v136_v32 = vpop.f32.mrf.mxu2  ;;  %210 = vadd.xlane.f32.xlu2 %v209_v30  ;;  %v115_v33 = vpop.f32.mrf.mxu0  ;;  %198 = vadd.xlane.f32.xlu0 %v197_v31 }
  0x8f   :  { %v137_v34 = vadd.f32 %v527_v20, %v136_v32  ;;  %v116_v35 = vadd.f32 %v527_v20, %v115_v33  ;;  %v127_v36 = vpop.f32.mrf.mxu1  ;;  %v148_v37 = vpop.f32.mrf.mxu3 }
  0x90   :  { %v128_v38 = vadd.f32 %v527_v20, %v127_v36  ;;  %v149_v5 = vadd.f32 %v527_v20, %v148_v37 }
  0x91   :  { %v168_v39 = vmax.f32 %v137_v34, 0.0  ;;  %v161_v40 = vmax.f32 %v116_v35, 0.0 }
  0x92   :  { %v165_v43 = vmax.f32 %v128_v38, 0.0  ;;  %v172_v10 = vmax.f32 %v149_v5, 0.0 }
  0x93   :  { %v188_v41 = vmul.f32 %v534_v25, %v168_v39  ;;  %v181_v42 = vmul.f32 %v534_v25, %v161_v40 }
  0x94   :  { %v185_v53 = vmul.f32 %v534_v25, %v165_v43  ;;  %v192_v21 = vmul.f32 %v534_v25, %v172_v10 }
  0x95   :  { %v221_v44 = vsel %vm196_vm1, %v188_v41, 0.0  ;;  %v200_v45 = vsel %vm196_vm1, %v181_v42, 0.0 }
  0x96   :  { %v139_v46 = vpop.f32.mrf.mxu2  ;;  %222 = vadd.xlane.f32.xlu2 %v221_v44  ;;  %v118_v47 = vpop.f32.mrf.mxu0  ;;  %201 = vadd.xlane.f32.xlu0 %v200_v45  ;;  %v212_v59 = vsel %vm196_vm1, %v185_v53, 0.0  ;;  %v233_v28 = vsel %vm196_vm1, %v192_v21, 0.0  ;;  %v279_v45 = vlaneseq }
  0x97   :  { %v140_v48 = vadd.f32 %v527_v20, %v139_v46  ;;  %v119_v49 = vadd.f32 %v527_v20, %v118_v47  ;;  %v130_v50 = vpop.f32.mrf.mxu1  ;;  %v151_v51 = vpop.f32.mrf.mxu3 }
  0x98   :  { %v131_v52 = vadd.f32 %v527_v20, %v130_v50  ;;  %v152_v33 = vadd.f32 %v527_v20, %v151_v51  ;;  %v582_v47 = vand.u32 127, %v279_v45 }
  0x99   :  { %v169_v54 = vmax.f32 %v140_v48, 0.0  ;;  %v162_v55 = vmax.f32 %v119_v49, 0.0  ;;  %v587_v48 = vstv %s628_s4  ;;  %s417_s4 = smov [#allocation3]  }
  0x9a   :  { %v166_v56 = vmax.f32 %v131_v52, 0.0  ;;  %v173_v37 = vmax.f32 %v152_v33, 0.0  ;;  %v286_v52 = vadd.s32 4294967280, %v582_v47  ;;  %v318_v21 = vadd.s32 4294967216, %v582_v47  ;;  %s349_s9 = sshll.u32 %s417_s4, 4  ;;  %s350_s9 = int_to_ptr.vmem [resolvable:$true] %s349_s9 }
  0x9b   :  { %v182_v57 = vmul.f32 %v534_v25, %v162_v55  ;;  %v189_v58 = vmul.f32 %v534_v25, %v169_v54 }
  0x9c   :  { %v186_v2 = vmul.f32 %v534_v25, %v166_v56  ;;  %v193_v38 = vmul.f32 %v534_v25, %v173_v37  ;;  %v290_v56 = vadd.s32 4294967272, %v582_v47 }
  0x9d   :  { %v203_v60 = vsel %vm196_vm1, %v182_v57, 0.0  ;;  %v224_v61 = vsel %vm196_vm1, %v189_v58, 0.0  ;;  %v294_v57 = vadd.s32 4294967264, %v582_v47 }
  0x9e   :  { %v142_v62 = vpop.f32.mrf.mxu2  ;;  %204 = vadd.xlane.f32.xlu1 %v203_v60  ;;  %225 = vadd.xlane.f32.xlu0 %v224_v61  ;;  %v121_v63 = vpop.f32.mrf.mxu0  ;;  %v215_v8 = vsel %vm196_vm1, %v186_v2, 0.0  ;;  %v236_v39 = vsel %vm196_vm1, %v193_v38, 0.0  ;;  %v330_v38 = vadd.s32 4294967192, %v582_v47 }
  0x9f   :  { %v143_v0 = vadd.f32 %v527_v20, %v142_v62  ;;  %213 = vadd.xlane.f32.xlu2 %v212_v59  ;;  %v122_v1 = vadd.f32 %v527_v20, %v121_v63  ;;  %v154_v3 = vpop.f32.mrf.mxu3  ;;  %v133_v9 = vpop.f32.mrf.mxu1  ;;  %v298_v63 = vadd.s32 4294967256, %v582_v47 }
  0xa0   :  { %v134_v14 = vadd.f32 %v527_v20, %v133_v9  ;;  %v155_v17 = vadd.f32 %v527_v20, %v154_v3 }
  0xa1   :  { %v170_v4 = vmax.f32 %v143_v0, 0.0  ;;  %v163_v6 = vmax.f32 %v122_v1, 0.0 }
  0xa2   :  { %v167_v22 = vmax.f32 %v134_v14, 0.0  ;;  %v174_v27 = vmax.f32 %v155_v17, 0.0 }
  0xa3   :  { %v190_v7 = vmul.f32 %v534_v25, %v170_v4  ;;  %v183_v15 = vmul.f32 %v534_v25, %v163_v6 }
  0xa4   :  { %v187_v30 = vmul.f32 %v534_v25, %v167_v22  ;;  %v194_v32 = vmul.f32 %v534_v25, %v174_v27 }
  0xa5   :  { %v227_v11 = vsel %vm196_vm1, %v190_v7, 0.0  ;;  %v206_v23 = vsel %vm196_vm1, %v183_v15, 0.0  ;;  %v314_v15 = vadd.s32 4294967224, %v582_v47 }
  0xa6   :  { %228 = vadd.xlane.f32.xlu1 %v227_v11  ;;  %216 = vadd.xlane.f32.xlu0 %v215_v8  ;;  %v145_v12 = vpop.f32.mrf.mxu2  ;;  %v218_v34 = vsel %vm196_vm1, %v187_v30, 0.0  ;;  %v239_v36 = vsel %vm196_vm1, %v194_v32, 0.0  ;;  %v302_v8 = vadd.s32 4294967248, %v582_v47 }
  0xa7   :  { %v146_v13 = vadd.f32 %v527_v20, %v145_v12  ;;  %v157_v16 = vpop.f32.mrf.mxu3  ;;  %v306_v12 = vadd.s32 4294967240, %v582_v47 }
  0xa8   :  { %v158_v18 = vadd.f32 %v527_v20, %v157_v16 }
  0xa9   :  { %v171_v19 = vmax.f32 %v146_v13, 0.0  ;;  %v310_v13 = vadd.s32 4294967232, %v582_v47 }
  0xaa   :  { %v175_v26 = vmax.f32 %v158_v18, 0.0 }
  0xab   :  { %v191_v24 = vmul.f32 %v534_v25, %v171_v19 }
  0xac   :  { %v195_v31 = vmul.f32 %v534_v25, %v175_v26  ;;  %v282_v25 = vadd.s32 4294967288, %v582_v47 }
  0xad   :  { %v230_v29 = vsel %vm196_vm1, %v191_v24, 0.0  ;;  %v322_v24 = vadd.s32 4294967208, %v582_v47 }
  0xae   :  { %207 = vadd.xlane.f32.xlu1 %v206_v23  ;;  %234 = vadd.xlane.f32.xlu0 %v233_v28  ;;  %v242_v35 = vsel %vm196_vm1, %v195_v31, 0.0 }
  0xaf   :  { %231 = vadd.xlane.f32.xlu2 %v230_v29  ;;  %v326_v29 = vadd.s32 4294967200, %v582_v47 }
  0xb6   :  { %219 = vadd.xlane.f32.xlu1 %v218_v34  ;;  %243 = vadd.xlane.f32.xlu0 %v242_v35 }
  0xb7   :  { %240 = vadd.xlane.f32.xlu2 %v239_v36 }
  0xbe   :  { %237 = vadd.xlane.f32.xlu1 %v236_v39 }
 0x101   :  { %v199_v40 = vpop.xlane.xlu0 %198  ;;  %v211_v42 = vpop.xlane.xlu2 %210 }
 0x102   :  { %v247_v54 = vadd.f32 %v587_v48, %v199_v40  ;;  %v251_v58 = vadd.f32 %v587_v48, %v211_v42 }
 0x104   :  { %v281_v61 = vperm.slane %v247_v54, %v582_v47  ;;  %v295_v4 = vperm.slane %v251_v58, %v294_v57 }
 0x109   :  { %v202_v41 = vpop.xlane.xlu0 %201  ;;  %v223_v44 = vpop.xlane.xlu2 %222 }
 0x10a   :  { %v248_v50 = vadd.f32 %v587_v48, %v202_v41  ;;  %v255_v14 = vadd.f32 %v587_v48, %v223_v44  ;;  %v338_v41 = vadd.s32 4294967176, %v582_v47 }
 0x10c   :  { %v283_v55 = vperm.slane %v248_v50, %v282_v25  ;;  %v311_v28 = vperm.slane %v255_v14, %v310_v13 }
 0x10e   :  { %v285_v0 = vsel %vm284_vm2, %v283_v55, %v281_v61 }
 0x111   :  { %v205_v43 = vpop.xlane.xlu1 %204  ;;  %v226_v20 = vpop.xlane.xlu0 %225 }
 0x112   :  { %v214_v51 = vpop.xlane.xlu2 %213  ;;  %v249_v53 = vadd.f32 %v587_v48, %v205_v43  ;;  %v256_v17 = vadd.f32 %v587_v48, %v226_v20  ;;  %v334_v43 = vadd.s32 4294967184, %v582_v47 }
 0x113   :  { %v252_v1 = vadd.f32 %v587_v48, %v214_v51 }
 0x114   :  { %v287_v59 = vperm.slane %v249_v53, %v286_v52  ;;  %v315_v32 = vperm.slane %v256_v17, %v314_v15 }
 0x115   :  { %v299_v11 = vperm.slane %v252_v1, %v298_v63 }
 0x116   :  { %v289_v5 = vsel %vm288_vm3, %v287_v59, %v285_v0 }
 0x119   :  { %v229_v46 = vpop.xlane.xlu1 %228  ;;  %v217_v49 = vpop.xlane.xlu0 %216 }
 0x11a   :  { %v253_v9 = vadd.f32 %v587_v48, %v217_v49  ;;  %v257_v22 = vadd.f32 %v587_v48, %v229_v46 }
 0x11c   :  { %v303_v23 = vperm.slane %v253_v9, %v302_v8  ;;  %v319_v35 = vperm.slane %v257_v22, %v318_v21 }
 0x121   :  { %v208_v60 = vpop.xlane.xlu1 %207  ;;  %v235_v6 = vpop.xlane.xlu0 %234 }
 0x122   :  { %v250_v62 = vadd.f32 %v587_v48, %v208_v60  ;;  %v232_v3 = vpop.xlane.xlu2 %231  ;;  %v259_v36 = vadd.f32 %v587_v48, %v235_v6 }
 0x123   :  { %v258_v26 = vadd.f32 %v587_v48, %v232_v3 }
 0x124   :  { %v291_v2 = vperm.slane %v250_v62, %v290_v56  ;;  %v327_v25 = vperm.slane %v259_v36, %v326_v29 }
 0x125   :  { %v323_v39 = vperm.slane %v258_v26, %v322_v24 }
 0x126   :  { %v293_v7 = vsel %vm292_vm4, %v291_v2, %v289_v5 }
 0x127   :  { %v297_v10 = vsel %vm296_vm5, %v295_v4, %v293_v7 }
 0x128   :  { %v301_v19 = vsel %vm300_vm6, %v299_v11, %v297_v10 }
 0x129   :  { %v220_v16 = vpop.xlane.xlu1 %219  ;;  %v305_v30 = vsel %vm304_vm7, %v303_v23, %v301_v19  ;;  %v244_v31 = vpop.xlane.xlu0 %243 }
 0x12a   :  { %v254_v18 = vadd.f32 %v587_v48, %v220_v16  ;;  %v241_v34 = vpop.xlane.xlu2 %240  ;;  %v262_v42 = vadd.f32 %v587_v48, %v244_v31 }
 0x12b   :  { %v261_v20 = vadd.f32 %v587_v48, %v241_v34 }
 0x12c   :  { %v307_v27 = vperm.slane %v254_v18, %v306_v12  ;;  %v339_v51 = vperm.slane %v262_v42, %v338_v41 }
 0x12d   :  { %v335_v47 = vperm.slane %v261_v20, %v334_v43 }
 0x12e   :  { %v309_v33 = vsel %vm308_vm8, %v307_v27, %v305_v30 }
 0x12f   :  { %v313_v37 = vsel %vm312_vm9, %v311_v28, %v309_v33 }
 0x130   :  { %v317_v40 = vsel %vm316_vm10, %v315_v32, %v313_v37 }
 0x131   :  { %v238_v44 = vpop.xlane.xlu1 %237  ;;  %v321_v45 = vsel %vm320_vm11, %v319_v35, %v317_v40 }
 0x132   :  { %v260_v46 = vadd.f32 %v587_v48, %v238_v44  ;;  %v325_v49 = vsel %vm324_vm12, %v323_v39, %v321_v45 }
 0x133   :  { %v329_v52 = vsel %vm328_vm13, %v327_v25, %v325_v49 }
 0x134   :  { %v331_v50 = vperm.slane %v260_v46, %v330_v38 }
 0x136   :  { %v333_v53 = vsel %vm332_vm14, %v331_v50, %v329_v52 }
 0x137   :  { %v337_v54 = vsel %vm336_vm15, %v335_v47, %v333_v53 }
 0x138   :  { %v341_v48 = vsel %vm340_vm0, %v339_v51, %v337_v54 }
 0x139   :  { %343 = vst [vmem:[#allocation3] sm:$0x1] %v341_v48 }
 0x13a   :  { %354 = dma.vmem_to_hbm [thread:$0]  %s350_s9, 16, %s352_s12, [#allocation4]  }
 0x13b   :  { %415 = dma.done.wait [#allocation4], 16  }
 0x13c   :  { %416 = vsyncadd [#allocation4], 4294967280 }
 0x13d   :  { %359 = vsyncpa [#allocation4], 1 }

</bundles_post_ra>
